<compile_context>
chip_gen: v6e
topology: v6e:2x2x1
jax: 0.10.0
libtpu: 0.0.40
codegen_flags: <defaults>
</compile_context>

<pallas_src>
import functools

import jax
import jax.numpy as jnp
from jax import lax
from jax.experimental import pallas as pl
from jax.experimental.pallas import tpu as pltpu


def _round_up(x, m):
    return (x + m - 1) // m * m


def _conv_sc_kernel(rc_ref, x_ref, w_ref, p_ref, o_ref, cols_ref,
                    *, C_in, H, W, HW, eps):
    # rc_ref:   (2, HWp) int32  -- [0] = output row index (pad lanes -> H+8),
    #                              [1] = output col index
    # x_ref:    (1, C_in, HWp) bf16  -- flattened input for this batch element
    # w_ref:    (Cg, K) bf16         -- conv weights for this channel group
    # p_ref:    (Cg, 3) f32          -- [:,0]=conv bias, [:,1]=gamma, [:,2]=beta
    # o_ref:    (1, Cg, HWp) f32
    # cols_ref: (K, HWp) bf16 VMEM scratch -- im2col columns, persists across g
    HWp = cols_ref.shape[1]
    g = pl.program_id(1)

    # ---- build im2col columns once per batch element (g == 0) -------------
    @pl.when(g == 0)
    def _build_cols():
        xb = x_ref[0].astype(jnp.float32)          # (C_in, HWp)
        rows = rc_ref[0:1, :]                      # (1, HWp)
        cols = rc_ref[1:2, :]
        for dy in range(3):
            for dx in range(3):
                sy, sx = dy - 1, dx - 1
                t = dy * 3 + dx
                # result[i] = xb[i + sy*W + sx]  (wrap artifacts all masked)
                shift = (-(sy * W + sx)) % HWp
                shifted = pltpu.roll(xb, shift=shift, axis=1) if shift else xb
                r2 = rows + sy
                c2 = cols + sx
                m = (r2 >= 0) & (r2 < H) & (c2 >= 0) & (c2 < W)
                tap = jnp.where(m, shifted, 0.0)
                cols_ref[t * C_in:(t + 1) * C_in, :] = tap.astype(cols_ref.dtype)

    # ---- 3x3 conv as a single MXU matmul for this channel group -----------
    y = jnp.dot(w_ref[...], cols_ref[...],
                preferred_element_type=jnp.float32)           # (Cg, HWp) f32
    y = y + p_ref[:, 0:1]                                     # conv bias

    # ---- GroupNorm (this grid step == one group) + affine + SiLU ----------
    Cg = y.shape[0]
    valid = rc_ref[0:1, :] < H                                # lane validity
    ym = jnp.where(valid, y, 0.0)
    inv_n = 1.0 / (Cg * HW)
    s1 = jnp.sum(ym)                                          # single-pass stats
    s2 = jnp.sum(ym * ym)
    mean = s1 * inv_n
    var = jnp.maximum(s2 * inv_n - mean * mean, 0.0)
    z = (y - mean) * lax.rsqrt(var + eps)
    z = z * p_ref[:, 1:2] + p_ref[:, 2:3]                     # GN affine
    o_ref[0] = (z * jax.nn.sigmoid(z)).astype(o_ref.dtype)    # SiLU


@functools.partial(jax.jit, static_argnames=("groups", "eps"))
def conv_sc_forward(x, conv_w, conv_b, gamma, beta, *, groups=2, eps=1e-5):
    """ConvSC default forward: Conv2d(3x3, s=1, p=1) + GroupNorm(2, C_out) + SiLU.

    x:      (bs, C_in, H, W) NCHW  (a 5-D (b, t, c, h, w) input is flattened)
    conv_w: (C_out, C_in, 3, 3) OIHW
    conv_b, gamma, beta: (C_out,)
    returns (bs, C_out, H, W) float32
    """
    if x.ndim == 5:                        # (b, t, c, h, w) -> (b*t, c, h, w)
        x = x.reshape((-1,) + x.shape[2:])
    bs, C_in, H, W = x.shape
    C_out = conv_w.shape[0]
    assert C_out % groups == 0
    Cg = C_out // groups
    # TODO(synk): Cg not a multiple of 8 would need sublane-masked GN stats.
    assert Cg % 8 == 0, "channel-group size must be sublane aligned"
    HW = H * W
    HWp = _round_up(HW, 128)               # lane-dense stores for any H*W
    C_in_p = _round_up(C_in, 8)            # sublane-aligned tap rows
    K = 9 * C_in_p

    # ---- wrapper-side glue: one cheap cast/pad pass, no im2col blow-up ----
    x_flat = x.reshape(bs, C_in, HW)
    x_flat = jnp.pad(x_flat, ((0, 0), (0, C_in_p - C_in), (0, HWp - HW)))
    x_bf = x_flat.astype(jnp.bfloat16)                          # (bs, C_in_p, HWp)

    # w_flat[o, t*C_in_p + i] = conv_w[o, i, dy, dx],  tap t = dy*3 + dx
    w_p = jnp.pad(conv_w, ((0, 0), (0, C_in_p - C_in), (0, 0), (0, 0)))
    w_flat = jnp.transpose(w_p, (2, 3, 1, 0)).reshape(K, C_out).T
    w_bf = w_flat.astype(jnp.bfloat16)                          # (C_out, K)

    params = jnp.stack([conv_b, gamma, beta], axis=1).astype(jnp.float32)  # (C_out, 3)

    # precomputed row/col indices of each flattened output pixel (pad rows > H)
    p_idx = jnp.arange(HWp, dtype=jnp.int32)
    row_idx = jnp.where(p_idx < HW, p_idx // W, H + 8).astype(jnp.int32)
    col_idx = (p_idx % W).astype(jnp.int32)
    rc = jnp.stack([row_idx, col_idx], axis=0)                  # (2, HWp)

    kernel = functools.partial(_conv_sc_kernel, C_in=C_in_p, H=H, W=W,
                               HW=HW, eps=eps)

    bytes_accessed = (x_bf.size * 2 + w_bf.size * 2 * groups + rc.size * 4
                      + params.size * 4 + bs * C_out * HWp * 4)
    cost = pl.CostEstimate(flops=2 * bs * C_out * K * HW,
                           transcendentals=bs * C_out * HW,
                           bytes_accessed=bytes_accessed)

    out = pl.pallas_call(
        kernel,
        out_shape=jax.ShapeDtypeStruct((bs, C_out, HWp), jnp.float32),
        grid_spec=pltpu.PrefetchScalarGridSpec(
            num_scalar_prefetch=0,
            grid=(bs, groups),
            in_specs=[
                pl.BlockSpec((2, HWp), lambda b, g: (0, 0)),              # rc
                pl.BlockSpec((1, C_in_p, HWp), lambda b, g: (b, 0, 0)),   # x
                pl.BlockSpec((Cg, K), lambda b, g: (g, 0)),               # weights
                pl.BlockSpec((Cg, 3), lambda b, g: (g, 0)),               # bias/γ/β
            ],
            out_specs=pl.BlockSpec((1, Cg, HWp), lambda b, g: (b, g, 0)),
            scratch_shapes=[pltpu.VMEM((K, HWp), jnp.bfloat16)],
        ),
        compiler_params=pltpu.CompilerParams(
            dimension_semantics=("parallel", "arbitrary"),
            vmem_limit_bytes=32 * 1024 * 1024),
        cost_estimate=cost,
    )(rc, x_bf, w_bf, params)

    return out[:, :, :HW].reshape(bs, C_out, H, W)


def _reference(x, conv_w, conv_b, gamma, beta, groups=2, eps=1e-5,
               matmul_dtype=jnp.float32):
    bs, C_in, H, W = x.shape
    C_out = conv_w.shape[0]
    y = lax.conv_general_dilated(
        x.astype(matmul_dtype), conv_w.astype(matmul_dtype),
        window_strides=(1, 1), padding="SAME",
        dimension_numbers=("NCHW", "OIHW", "NCHW"),
        preferred_element_type=jnp.float32)
    y = y + conv_b[None, :, None, None]
    Cg = C_out // groups
    yg = y.reshape(bs, groups, Cg, H, W)
    mean = yg.mean(axis=(2, 3, 4), keepdims=True)
    var = ((yg - mean) ** 2).mean(axis=(2, 3, 4), keepdims=True)
    yn = ((yg - mean) / jnp.sqrt(var + eps)).reshape(bs, C_out, H, W)
    z = yn * gamma[None, :, None, None] + beta[None, :, None, None]
    return z * jax.nn.sigmoid(z)


if __name__ == "__main__":
    bs, C_in, C_out, H, W = 2, 16, 32, 16, 16        # HW = 256 -> lane-dense

    key = jax.random.PRNGKey(0)
    kx, kw, kb, kg, kb2 = jax.random.split(key, 5)

    x = jax.random.normal(kx, (bs, C_in, H, W), dtype=jnp.float32)

    # BasicConv2d init: trunc_normal_(std=0.02) weight, zero bias (small random
    # bias here so the bias path is exercised).
    conv_w = 0.02 * jax.random.normal(kw, (C_out, C_in, 3, 3), dtype=jnp.float32)
    conv_b = 0.01 * jax.random.normal(kb, (C_out,), dtype=jnp.float32)

    # GroupNorm(2, C_out) affine params (perturbed from gamma=1, beta=0).
    gamma = 1.0 + 0.1 * jax.random.normal(kg, (C_out,), dtype=jnp.float32)
    beta = 0.1 * jax.random.normal(kb2, (C_out,), dtype=jnp.float32)

    out = conv_sc_forward(x, conv_w, conv_b, gamma, beta)
    out = jax.block_until_ready(out)
    assert out.shape == (bs, C_out, H, W), out.shape

    # Apples-to-apples check: reference with the same bf16 matmul operands.
    ref_bf = _reference(x, conv_w, conv_b, gamma, beta, matmul_dtype=jnp.bfloat16)
    err_bf = float(jnp.max(jnp.abs(out - ref_bf)))
    assert jnp.allclose(out, ref_bf, atol=1e-2, rtol=1e-2), err_bf

    # Full-f32 module semantics (bounded drift from bf16 MXU operands).
    ref_f32 = _reference(x, conv_w, conv_b, gamma, beta)
    err_f32 = float(jnp.max(jnp.abs(out - ref_f32)))
    assert jnp.allclose(out, ref_f32, atol=7e-2, rtol=7e-2), err_f32

    print("KERNEL_OK")
</pallas_src>

<mosaic_0001>
module attributes {stable_mosaic.version = 11 : i64} {
  func.func @_conv_sc_kernel(%arg0: i32, %arg1: i32, %arg2: memref<2x256xi32, #tpu.memory_space<vmem>>, %arg3: memref<1x16x256xbf16, #tpu.memory_space<vmem>>, %arg4: memref<16x144xbf16, #tpu.memory_space<vmem>>, %arg5: memref<16x3xf32, #tpu.memory_space<vmem>>, %arg6: memref<1x16x256xf32, #tpu.memory_space<vmem>>, %arg7: memref<144x256xbf16, #tpu.memory_space<vmem>>) attributes {dimension_semantics = [#tpu.dimension_semantics<parallel>, #tpu.dimension_semantics<arbitrary>], iteration_bounds = array<i64: 2, 2>, scalar_prefetch = 0 : i64, scratch_operands = 1 : i64, tpu.core_type = #tpu.core_type<tc>, window_params = [{pipeline_mode = #tpu.pipeline_mode<synchronous>, transform_indices = @transform_0, window_bounds = array<i64: 2, 256>}, {transform_indices = @transform_1, window_bounds = array<i64: 1, 16, 256>}, {transform_indices = @transform_2, window_bounds = array<i64: 16, 144>}, {transform_indices = @transform_3, window_bounds = array<i64: 16, 3>}, {transform_indices = @transform_4, window_bounds = array<i64: 1, 16, 256>}]} {
    %c0_i32 = arith.constant 0 : i32
    %0 = arith.cmpi eq, %arg1, %c0_i32 : i32
    %1 = arith.extui %0 : i1 to i32
    %c0_i32_0 = arith.constant 0 : i32
    %2 = arith.cmpi ne, %1, %c0_i32_0 : i32
    scf.if %2 {
      %c0_21 = arith.constant 0 : index
      %c0_22 = arith.constant 0 : index
      %c0_23 = arith.constant 0 : index
      %51 = vector.load %arg3[%c0_21, %c0_22, %c0_23] : memref<1x16x256xbf16, #tpu.memory_space<vmem>>, vector<1x16x256xbf16>
      %52 = vector.shape_cast %51 : vector<1x16x256xbf16> to vector<16x256xbf16>
      %53 = arith.extf %52 : vector<16x256xbf16> to vector<16x256xf32>
      %c0_24 = arith.constant 0 : index
      %c0_25 = arith.constant 0 : index
      %54 = vector.load %arg2[%c0_24, %c0_25] : memref<2x256xi32, #tpu.memory_space<vmem>>, vector<1x256xi32>
      %c1_26 = arith.constant 1 : index
      %c0_27 = arith.constant 0 : index
      %55 = vector.load %arg2[%c1_26, %c0_27] : memref<2x256xi32, #tpu.memory_space<vmem>>, vector<1x256xi32>
      %c17_i32 = arith.constant 17 : i32
      %56 = tpu.dynamic_rotate %53 by %c17_i32 dim 1 : vector<16x256xf32>, i32 -> vector<16x256xf32>
      %c-1_i32 = arith.constant -1 : i32
      %57 = vector.broadcast %c-1_i32 : i32 to vector<1x256xi32>
      %58 = arith.addi %54, %57 : vector<1x256xi32>
      %c-1_i32_28 = arith.constant -1 : i32
      %59 = vector.broadcast %c-1_i32_28 : i32 to vector<1x256xi32>
      %60 = arith.addi %55, %59 : vector<1x256xi32>
      %c0_i32_29 = arith.constant 0 : i32
      %61 = vector.broadcast %c0_i32_29 : i32 to vector<1x256xi32>
      %62 = arith.cmpi sge, %58, %61 : vector<1x256xi32>
      %c16_i32_30 = arith.constant 16 : i32
      %63 = vector.broadcast %c16_i32_30 : i32 to vector<1x256xi32>
      %64 = arith.cmpi slt, %58, %63 : vector<1x256xi32>
      %65 = arith.andi %62, %64 : vector<1x256xi1>
      %c0_i32_31 = arith.constant 0 : i32
      %66 = vector.broadcast %c0_i32_31 : i32 to vector<1x256xi32>
      %67 = arith.cmpi sge, %60, %66 : vector<1x256xi32>
      %68 = arith.andi %65, %67 : vector<1x256xi1>
      %c16_i32_32 = arith.constant 16 : i32
      %69 = vector.broadcast %c16_i32_32 : i32 to vector<1x256xi32>
      %70 = arith.cmpi slt, %60, %69 : vector<1x256xi32>
      %71 = arith.andi %68, %70 : vector<1x256xi1>
      %cst_33 = arith.constant 0.000000e+00 : f32
      %72 = vector.shape_cast %71 : vector<1x256xi1> to vector<1x256xi1>
      %73 = vector.broadcast %72 : vector<1x256xi1> to vector<16x256xi1>
      %74 = vector.broadcast %cst_33 : f32 to vector<16x256xf32>
      %75 = arith.select %73, %56, %74 : vector<16x256xi1>, vector<16x256xf32>
      %76 = arith.truncf %75 : vector<16x256xf32> to vector<16x256xbf16>
      %c0_34 = arith.constant 0 : index
      %c0_35 = arith.constant 0 : index
      %77 = vector.load %arg7[%c0_34, %c0_35] : memref<144x256xbf16, #tpu.memory_space<vmem>>, vector<16x256xbf16>
      tpu.vector_store %arg7[%c0_34, %c0_35], %76 {strides = array<i32>} : memref<144x256xbf16, #tpu.memory_space<vmem>>, vector<16x256xbf16>,
      %c16_i32_36 = arith.constant 16 : i32
      %78 = tpu.dynamic_rotate %53 by %c16_i32_36 dim 1 : vector<16x256xf32>, i32 -> vector<16x256xf32>
      %c-1_i32_37 = arith.constant -1 : i32
      %79 = vector.broadcast %c-1_i32_37 : i32 to vector<1x256xi32>
      %80 = arith.addi %54, %79 : vector<1x256xi32>
      %c0_i32_38 = arith.constant 0 : i32
      %81 = vector.broadcast %c0_i32_38 : i32 to vector<1x256xi32>
      %82 = arith.addi %55, %81 : vector<1x256xi32>
      %c0_i32_39 = arith.constant 0 : i32
      %83 = vector.broadcast %c0_i32_39 : i32 to vector<1x256xi32>
      %84 = arith.cmpi sge, %80, %83 : vector<1x256xi32>
      %c16_i32_40 = arith.constant 16 : i32
      %85 = vector.broadcast %c16_i32_40 : i32 to vector<1x256xi32>
      %86 = arith.cmpi slt, %80, %85 : vector<1x256xi32>
      %87 = arith.andi %84, %86 : vector<1x256xi1>
      %c0_i32_41 = arith.constant 0 : i32
      %88 = vector.broadcast %c0_i32_41 : i32 to vector<1x256xi32>
      %89 = arith.cmpi sge, %82, %88 : vector<1x256xi32>
      %90 = arith.andi %87, %89 : vector<1x256xi1>
      %c16_i32_42 = arith.constant 16 : i32
      %91 = vector.broadcast %c16_i32_42 : i32 to vector<1x256xi32>
      %92 = arith.cmpi slt, %82, %91 : vector<1x256xi32>
      %93 = arith.andi %90, %92 : vector<1x256xi1>
      %cst_43 = arith.constant 0.000000e+00 : f32
      %94 = vector.shape_cast %93 : vector<1x256xi1> to vector<1x256xi1>
      %95 = vector.broadcast %94 : vector<1x256xi1> to vector<16x256xi1>
      %96 = vector.broadcast %cst_43 : f32 to vector<16x256xf32>
      %97 = arith.select %95, %78, %96 : vector<16x256xi1>, vector<16x256xf32>
      %98 = arith.truncf %97 : vector<16x256xf32> to vector<16x256xbf16>
      %c16 = arith.constant 16 : index
      %c0_44 = arith.constant 0 : index
      %99 = vector.load %arg7[%c16, %c0_44] : memref<144x256xbf16, #tpu.memory_space<vmem>>, vector<16x256xbf16>
      tpu.vector_store %arg7[%c16, %c0_44], %98 {strides = array<i32>} : memref<144x256xbf16, #tpu.memory_space<vmem>>, vector<16x256xbf16>,
      %c15_i32 = arith.constant 15 : i32
      %100 = tpu.dynamic_rotate %53 by %c15_i32 dim 1 : vector<16x256xf32>, i32 -> vector<16x256xf32>
      %c-1_i32_45 = arith.constant -1 : i32
      %101 = vector.broadcast %c-1_i32_45 : i32 to vector<1x256xi32>
      %102 = arith.addi %54, %101 : vector<1x256xi32>
      %c1_i32 = arith.constant 1 : i32
      %103 = vector.broadcast %c1_i32 : i32 to vector<1x256xi32>
      %104 = arith.addi %55, %103 : vector<1x256xi32>
      %c0_i32_46 = arith.constant 0 : i32
      %105 = vector.broadcast %c0_i32_46 : i32 to vector<1x256xi32>
      %106 = arith.cmpi sge, %102, %105 : vector<1x256xi32>
      %c16_i32_47 = arith.constant 16 : i32
      %107 = vector.broadcast %c16_i32_47 : i32 to vector<1x256xi32>
      %108 = arith.cmpi slt, %102, %107 : vector<1x256xi32>
      %109 = arith.andi %106, %108 : vector<1x256xi1>
      %c0_i32_48 = arith.constant 0 : i32
      %110 = vector.broadcast %c0_i32_48 : i32 to vector<1x256xi32>
      %111 = arith.cmpi sge, %104, %110 : vector<1x256xi32>
      %112 = arith.andi %109, %111 : vector<1x256xi1>
      %c16_i32_49 = arith.constant 16 : i32
      %113 = vector.broadcast %c16_i32_49 : i32 to vector<1x256xi32>
      %114 = arith.cmpi slt, %104, %113 : vector<1x256xi32>
      %115 = arith.andi %112, %114 : vector<1x256xi1>
      %cst_50 = arith.constant 0.000000e+00 : f32
      %116 = vector.shape_cast %115 : vector<1x256xi1> to vector<1x256xi1>
      %117 = vector.broadcast %116 : vector<1x256xi1> to vector<16x256xi1>
      %118 = vector.broadcast %cst_50 : f32 to vector<16x256xf32>
      %119 = arith.select %117, %100, %118 : vector<16x256xi1>, vector<16x256xf32>
      %120 = arith.truncf %119 : vector<16x256xf32> to vector<16x256xbf16>
      %c32 = arith.constant 32 : index
      %c0_51 = arith.constant 0 : index
      %121 = vector.load %arg7[%c32, %c0_51] : memref<144x256xbf16, #tpu.memory_space<vmem>>, vector<16x256xbf16>
      tpu.vector_store %arg7[%c32, %c0_51], %120 {strides = array<i32>} : memref<144x256xbf16, #tpu.memory_space<vmem>>, vector<16x256xbf16>,
      %c1_i32_52 = arith.constant 1 : i32
      %122 = tpu.dynamic_rotate %53 by %c1_i32_52 dim 1 : vector<16x256xf32>, i32 -> vector<16x256xf32>
      %c0_i32_53 = arith.constant 0 : i32
      %123 = vector.broadcast %c0_i32_53 : i32 to vector<1x256xi32>
      %124 = arith.addi %54, %123 : vector<1x256xi32>
      %c-1_i32_54 = arith.constant -1 : i32
      %125 = vector.broadcast %c-1_i32_54 : i32 to vector<1x256xi32>
      %126 = arith.addi %55, %125 : vector<1x256xi32>
      %c0_i32_55 = arith.constant 0 : i32
      %127 = vector.broadcast %c0_i32_55 : i32 to vector<1x256xi32>
      %128 = arith.cmpi sge, %124, %127 : vector<1x256xi32>
      %c16_i32_56 = arith.constant 16 : i32
      %129 = vector.broadcast %c16_i32_56 : i32 to vector<1x256xi32>
      %130 = arith.cmpi slt, %124, %129 : vector<1x256xi32>
      %131 = arith.andi %128, %130 : vector<1x256xi1>
      %c0_i32_57 = arith.constant 0 : i32
      %132 = vector.broadcast %c0_i32_57 : i32 to vector<1x256xi32>
      %133 = arith.cmpi sge, %126, %132 : vector<1x256xi32>
      %134 = arith.andi %131, %133 : vector<1x256xi1>
      %c16_i32_58 = arith.constant 16 : i32
      %135 = vector.broadcast %c16_i32_58 : i32 to vector<1x256xi32>
      %136 = arith.cmpi slt, %126, %135 : vector<1x256xi32>
      %137 = arith.andi %134, %136 : vector<1x256xi1>
      %cst_59 = arith.constant 0.000000e+00 : f32
      %138 = vector.shape_cast %137 : vector<1x256xi1> to vector<1x256xi1>
      %139 = vector.broadcast %138 : vector<1x256xi1> to vector<16x256xi1>
      %140 = vector.broadcast %cst_59 : f32 to vector<16x256xf32>
      %141 = arith.select %139, %122, %140 : vector<16x256xi1>, vector<16x256xf32>
      %142 = arith.truncf %141 : vector<16x256xf32> to vector<16x256xbf16>
      %c48 = arith.constant 48 : index
      %c0_60 = arith.constant 0 : index
      %143 = vector.load %arg7[%c48, %c0_60] : memref<144x256xbf16, #tpu.memory_space<vmem>>, vector<16x256xbf16>
      tpu.vector_store %arg7[%c48, %c0_60], %142 {strides = array<i32>} : memref<144x256xbf16, #tpu.memory_space<vmem>>, vector<16x256xbf16>,
      %c0_i32_61 = arith.constant 0 : i32
      %144 = vector.broadcast %c0_i32_61 : i32 to vector<1x256xi32>
      %145 = arith.addi %54, %144 : vector<1x256xi32>
      %c0_i32_62 = arith.constant 0 : i32
      %146 = vector.broadcast %c0_i32_62 : i32 to vector<1x256xi32>
      %147 = arith.addi %55, %146 : vector<1x256xi32>
      %c0_i32_63 = arith.constant 0 : i32
      %148 = vector.broadcast %c0_i32_63 : i32 to vector<1x256xi32>
      %149 = arith.cmpi sge, %145, %148 : vector<1x256xi32>
      %c16_i32_64 = arith.constant 16 : i32
      %150 = vector.broadcast %c16_i32_64 : i32 to vector<1x256xi32>
      %151 = arith.cmpi slt, %145, %150 : vector<1x256xi32>
      %152 = arith.andi %149, %151 : vector<1x256xi1>
      %c0_i32_65 = arith.constant 0 : i32
      %153 = vector.broadcast %c0_i32_65 : i32 to vector<1x256xi32>
      %154 = arith.cmpi sge, %147, %153 : vector<1x256xi32>
      %155 = arith.andi %152, %154 : vector<1x256xi1>
      %c16_i32_66 = arith.constant 16 : i32
      %156 = vector.broadcast %c16_i32_66 : i32 to vector<1x256xi32>
      %157 = arith.cmpi slt, %147, %156 : vector<1x256xi32>
      %158 = arith.andi %155, %157 : vector<1x256xi1>
      %cst_67 = arith.constant 0.000000e+00 : f32
      %159 = vector.shape_cast %158 : vector<1x256xi1> to vector<1x256xi1>
      %160 = vector.broadcast %159 : vector<1x256xi1> to vector<16x256xi1>
      %161 = vector.broadcast %cst_67 : f32 to vector<16x256xf32>
      %162 = arith.select %160, %53, %161 : vector<16x256xi1>, vector<16x256xf32>
      %163 = arith.truncf %162 : vector<16x256xf32> to vector<16x256xbf16>
      %c64 = arith.constant 64 : index
      %c0_68 = arith.constant 0 : index
      %164 = vector.load %arg7[%c64, %c0_68] : memref<144x256xbf16, #tpu.memory_space<vmem>>, vector<16x256xbf16>
      tpu.vector_store %arg7[%c64, %c0_68], %163 {strides = array<i32>} : memref<144x256xbf16, #tpu.memory_space<vmem>>, vector<16x256xbf16>,
      %c255_i32 = arith.constant 255 : i32
      %165 = tpu.dynamic_rotate %53 by %c255_i32 dim 1 : vector<16x256xf32>, i32 -> vector<16x256xf32>
      %c0_i32_69 = arith.constant 0 : i32
      %166 = vector.broadcast %c0_i32_69 : i32 to vector<1x256xi32>
      %167 = arith.addi %54, %166 : vector<1x256xi32>
      %c1_i32_70 = arith.constant 1 : i32
      %168 = vector.broadcast %c1_i32_70 : i32 to vector<1x256xi32>
      %169 = arith.addi %55, %168 : vector<1x256xi32>
      %c0_i32_71 = arith.constant 0 : i32
      %170 = vector.broadcast %c0_i32_71 : i32 to vector<1x256xi32>
      %171 = arith.cmpi sge, %167, %170 : vector<1x256xi32>
      %c16_i32_72 = arith.constant 16 : i32
      %172 = vector.broadcast %c16_i32_72 : i32 to vector<1x256xi32>
      %173 = arith.cmpi slt, %167, %172 : vector<1x256xi32>
      %174 = arith.andi %171, %173 : vector<1x256xi1>
      %c0_i32_73 = arith.constant 0 : i32
      %175 = vector.broadcast %c0_i32_73 : i32 to vector<1x256xi32>
      %176 = arith.cmpi sge, %169, %175 : vector<1x256xi32>
      %177 = arith.andi %174, %176 : vector<1x256xi1>
      %c16_i32_74 = arith.constant 16 : i32
      %178 = vector.broadcast %c16_i32_74 : i32 to vector<1x256xi32>
      %179 = arith.cmpi slt, %169, %178 : vector<1x256xi32>
      %180 = arith.andi %177, %179 : vector<1x256xi1>
      %cst_75 = arith.constant 0.000000e+00 : f32
      %181 = vector.shape_cast %180 : vector<1x256xi1> to vector<1x256xi1>
      %182 = vector.broadcast %181 : vector<1x256xi1> to vector<16x256xi1>
      %183 = vector.broadcast %cst_75 : f32 to vector<16x256xf32>
      %184 = arith.select %182, %165, %183 : vector<16x256xi1>, vector<16x256xf32>
      %185 = arith.truncf %184 : vector<16x256xf32> to vector<16x256xbf16>
      %c80 = arith.constant 80 : index
      %c0_76 = arith.constant 0 : index
      %186 = vector.load %arg7[%c80, %c0_76] : memref<144x256xbf16, #tpu.memory_space<vmem>>, vector<16x256xbf16>
      tpu.vector_store %arg7[%c80, %c0_76], %185 {strides = array<i32>} : memref<144x256xbf16, #tpu.memory_space<vmem>>, vector<16x256xbf16>,
      %c241_i32 = arith.constant 241 : i32
      %187 = tpu.dynamic_rotate %53 by %c241_i32 dim 1 : vector<16x256xf32>, i32 -> vector<16x256xf32>
      %c1_i32_77 = arith.constant 1 : i32
      %188 = vector.broadcast %c1_i32_77 : i32 to vector<1x256xi32>
      %189 = arith.addi %54, %188 : vector<1x256xi32>
      %c-1_i32_78 = arith.constant -1 : i32
      %190 = vector.broadcast %c-1_i32_78 : i32 to vector<1x256xi32>
      %191 = arith.addi %55, %190 : vector<1x256xi32>
      %c0_i32_79 = arith.constant 0 : i32
      %192 = vector.broadcast %c0_i32_79 : i32 to vector<1x256xi32>
      %193 = arith.cmpi sge, %189, %192 : vector<1x256xi32>
      %c16_i32_80 = arith.constant 16 : i32
      %194 = vector.broadcast %c16_i32_80 : i32 to vector<1x256xi32>
      %195 = arith.cmpi slt, %189, %194 : vector<1x256xi32>
      %196 = arith.andi %193, %195 : vector<1x256xi1>
      %c0_i32_81 = arith.constant 0 : i32
      %197 = vector.broadcast %c0_i32_81 : i32 to vector<1x256xi32>
      %198 = arith.cmpi sge, %191, %197 : vector<1x256xi32>
      %199 = arith.andi %196, %198 : vector<1x256xi1>
      %c16_i32_82 = arith.constant 16 : i32
      %200 = vector.broadcast %c16_i32_82 : i32 to vector<1x256xi32>
      %201 = arith.cmpi slt, %191, %200 : vector<1x256xi32>
      %202 = arith.andi %199, %201 : vector<1x256xi1>
      %cst_83 = arith.constant 0.000000e+00 : f32
      %203 = vector.shape_cast %202 : vector<1x256xi1> to vector<1x256xi1>
      %204 = vector.broadcast %203 : vector<1x256xi1> to vector<16x256xi1>
      %205 = vector.broadcast %cst_83 : f32 to vector<16x256xf32>
      %206 = arith.select %204, %187, %205 : vector<16x256xi1>, vector<16x256xf32>
      %207 = arith.truncf %206 : vector<16x256xf32> to vector<16x256xbf16>
      %c96 = arith.constant 96 : index
      %c0_84 = arith.constant 0 : index
      %208 = vector.load %arg7[%c96, %c0_84] : memref<144x256xbf16, #tpu.memory_space<vmem>>, vector<16x256xbf16>
      tpu.vector_store %arg7[%c96, %c0_84], %207 {strides = array<i32>} : memref<144x256xbf16, #tpu.memory_space<vmem>>, vector<16x256xbf16>,
      %c240_i32 = arith.constant 240 : i32
      %209 = tpu.dynamic_rotate %53 by %c240_i32 dim 1 : vector<16x256xf32>, i32 -> vector<16x256xf32>
      %c1_i32_85 = arith.constant 1 : i32
      %210 = vector.broadcast %c1_i32_85 : i32 to vector<1x256xi32>
      %211 = arith.addi %54, %210 : vector<1x256xi32>
      %c0_i32_86 = arith.constant 0 : i32
      %212 = vector.broadcast %c0_i32_86 : i32 to vector<1x256xi32>
      %213 = arith.addi %55, %212 : vector<1x256xi32>
      %c0_i32_87 = arith.constant 0 : i32
      %214 = vector.broadcast %c0_i32_87 : i32 to vector<1x256xi32>
      %215 = arith.cmpi sge, %211, %214 : vector<1x256xi32>
      %c16_i32_88 = arith.constant 16 : i32
      %216 = vector.broadcast %c16_i32_88 : i32 to vector<1x256xi32>
      %217 = arith.cmpi slt, %211, %216 : vector<1x256xi32>
      %218 = arith.andi %215, %217 : vector<1x256xi1>
      %c0_i32_89 = arith.constant 0 : i32
      %219 = vector.broadcast %c0_i32_89 : i32 to vector<1x256xi32>
      %220 = arith.cmpi sge, %213, %219 : vector<1x256xi32>
      %221 = arith.andi %218, %220 : vector<1x256xi1>
      %c16_i32_90 = arith.constant 16 : i32
      %222 = vector.broadcast %c16_i32_90 : i32 to vector<1x256xi32>
      %223 = arith.cmpi slt, %213, %222 : vector<1x256xi32>
      %224 = arith.andi %221, %223 : vector<1x256xi1>
      %cst_91 = arith.constant 0.000000e+00 : f32
      %225 = vector.shape_cast %224 : vector<1x256xi1> to vector<1x256xi1>
      %226 = vector.broadcast %225 : vector<1x256xi1> to vector<16x256xi1>
      %227 = vector.broadcast %cst_91 : f32 to vector<16x256xf32>
      %228 = arith.select %226, %209, %227 : vector<16x256xi1>, vector<16x256xf32>
      %229 = arith.truncf %228 : vector<16x256xf32> to vector<16x256xbf16>
      %c112 = arith.constant 112 : index
      %c0_92 = arith.constant 0 : index
      %230 = vector.load %arg7[%c112, %c0_92] : memref<144x256xbf16, #tpu.memory_space<vmem>>, vector<16x256xbf16>
      tpu.vector_store %arg7[%c112, %c0_92], %229 {strides = array<i32>} : memref<144x256xbf16, #tpu.memory_space<vmem>>, vector<16x256xbf16>,
      %c239_i32 = arith.constant 239 : i32
      %231 = tpu.dynamic_rotate %53 by %c239_i32 dim 1 : vector<16x256xf32>, i32 -> vector<16x256xf32>
      %c1_i32_93 = arith.constant 1 : i32
      %232 = vector.broadcast %c1_i32_93 : i32 to vector<1x256xi32>
      %233 = arith.addi %54, %232 : vector<1x256xi32>
      %c1_i32_94 = arith.constant 1 : i32
      %234 = vector.broadcast %c1_i32_94 : i32 to vector<1x256xi32>
      %235 = arith.addi %55, %234 : vector<1x256xi32>
      %c0_i32_95 = arith.constant 0 : i32
      %236 = vector.broadcast %c0_i32_95 : i32 to vector<1x256xi32>
      %237 = arith.cmpi sge, %233, %236 : vector<1x256xi32>
      %c16_i32_96 = arith.constant 16 : i32
      %238 = vector.broadcast %c16_i32_96 : i32 to vector<1x256xi32>
      %239 = arith.cmpi slt, %233, %238 : vector<1x256xi32>
      %240 = arith.andi %237, %239 : vector<1x256xi1>
      %c0_i32_97 = arith.constant 0 : i32
      %241 = vector.broadcast %c0_i32_97 : i32 to vector<1x256xi32>
      %242 = arith.cmpi sge, %235, %241 : vector<1x256xi32>
      %243 = arith.andi %240, %242 : vector<1x256xi1>
      %c16_i32_98 = arith.constant 16 : i32
      %244 = vector.broadcast %c16_i32_98 : i32 to vector<1x256xi32>
      %245 = arith.cmpi slt, %235, %244 : vector<1x256xi32>
      %246 = arith.andi %243, %245 : vector<1x256xi1>
      %cst_99 = arith.constant 0.000000e+00 : f32
      %247 = vector.shape_cast %246 : vector<1x256xi1> to vector<1x256xi1>
      %248 = vector.broadcast %247 : vector<1x256xi1> to vector<16x256xi1>
      %249 = vector.broadcast %cst_99 : f32 to vector<16x256xf32>
      %250 = arith.select %248, %231, %249 : vector<16x256xi1>, vector<16x256xf32>
      %251 = arith.truncf %250 : vector<16x256xf32> to vector<16x256xbf16>
      %c128 = arith.constant 128 : index
      %c0_100 = arith.constant 0 : index
      %252 = vector.load %arg7[%c128, %c0_100] : memref<144x256xbf16, #tpu.memory_space<vmem>>, vector<16x256xbf16>
      tpu.vector_store %arg7[%c128, %c0_100], %251 {strides = array<i32>} : memref<144x256xbf16, #tpu.memory_space<vmem>>, vector<16x256xbf16>,
    } else {
    }
    %c0 = arith.constant 0 : index
    %c0_1 = arith.constant 0 : index
    %3 = vector.load %arg4[%c0, %c0_1] : memref<16x144xbf16, #tpu.memory_space<vmem>>, vector<16x144xbf16>
    %c0_2 = arith.constant 0 : index
    %c0_3 = arith.constant 0 : index
    %4 = vector.load %arg7[%c0_2, %c0_3] : memref<144x256xbf16, #tpu.memory_space<vmem>>, vector<144x256xbf16>
    %cst = arith.constant dense<0.000000e+00> : vector<16x256xf32>
    %5 = tpu.matmul %3, %4, %cst {dimension_numbers = #tpu.dot_dimension_numbers<[1], [0], [0], [1], [0, 0, 1, 1], [], []>} : vector<16x144xbf16>, vector<144x256xbf16>, vector<16x256xf32> -> vector<16x256xf32>
    %c0_4 = arith.constant 0 : index
    %c0_5 = arith.constant 0 : index
    %6 = vector.load %arg5[%c0_4, %c0_5] : memref<16x3xf32, #tpu.memory_space<vmem>>, vector<16x1xf32>
    %7 = vector.broadcast %6 : vector<16x1xf32> to vector<16x256xf32>
    %8 = arith.addf %5, %7 : vector<16x256xf32>
    %c0_6 = arith.constant 0 : index
    %c0_7 = arith.constant 0 : index
    %9 = vector.load %arg2[%c0_6, %c0_7] : memref<2x256xi32, #tpu.memory_space<vmem>>, vector<1x256xi32>
    %c16_i32 = arith.constant 16 : i32
    %10 = vector.broadcast %c16_i32 : i32 to vector<1x256xi32>
    %11 = arith.cmpi slt, %9, %10 : vector<1x256xi32>
    %cst_8 = arith.constant 0.000000e+00 : f32
    %12 = vector.shape_cast %11 : vector<1x256xi1> to vector<1x256xi1>
    %13 = vector.broadcast %12 : vector<1x256xi1> to vector<16x256xi1>
    %14 = vector.broadcast %cst_8 : f32 to vector<16x256xf32>
    %15 = arith.select %13, %8, %14 : vector<16x256xi1>, vector<16x256xf32>
    %16 = vector.shape_cast %15 : vector<16x256xf32> to vector<1x16x256xf32>
    %cst_9 = arith.constant dense<0.000000e+00> : vector<1xf32>
    %17 = vector.multi_reduction <add>, %16, %cst_9 [1, 2] : vector<1x16x256xf32> to vector<1xf32>
    %18 = vector.shape_cast %17 : vector<1xf32> to vector<1x1x1xf32>
    %19 = vector.extract %18[0, 0, 0] : f32 from vector<1x1x1xf32>
    %20 = arith.mulf %15, %15 : vector<16x256xf32>
    %21 = vector.shape_cast %20 : vector<16x256xf32> to vector<1x16x256xf32>
    %cst_10 = arith.constant dense<0.000000e+00> : vector<1xf32>
    %22 = vector.multi_reduction <add>, %21, %cst_10 [1, 2] : vector<1x16x256xf32> to vector<1xf32>
    %23 = vector.shape_cast %22 : vector<1xf32> to vector<1x1x1xf32>
    %24 = vector.extract %23[0, 0, 0] : f32 from vector<1x1x1xf32>
    %cst_11 = arith.constant 2.44140625E-4 : f32
    %25 = arith.mulf %19, %cst_11 : f32
    %cst_12 = arith.constant 2.44140625E-4 : f32
    %26 = arith.mulf %24, %cst_12 : f32
    %27 = arith.mulf %25, %25 : f32
    %28 = arith.subf %26, %27 : f32
    %cst_13 = arith.constant 0.000000e+00 : f32
    %29 = arith.maximumf %28, %cst_13 : f32
    %30 = vector.broadcast %25 : f32 to vector<16x256xf32>
    %31 = arith.subf %8, %30 : vector<16x256xf32>
    %cst_14 = arith.constant 9.99999974E-6 : f32
    %32 = arith.addf %29, %cst_14 : f32
    %33 = math.rsqrt %32 : f32
    %34 = vector.broadcast %33 : f32 to vector<16x256xf32>
    %35 = arith.mulf %31, %34 : vector<16x256xf32>
    %c0_15 = arith.constant 0 : index
    %c1 = arith.constant 1 : index
    %36 = vector.load %arg5[%c0_15, %c1] : memref<16x3xf32, #tpu.memory_space<vmem>>, vector<16x1xf32>
    %37 = vector.broadcast %36 : vector<16x1xf32> to vector<16x256xf32>
    %38 = arith.mulf %35, %37 : vector<16x256xf32>
    %c0_16 = arith.constant 0 : index
    %c2 = arith.constant 2 : index
    %39 = vector.load %arg5[%c0_16, %c2] : memref<16x3xf32, #tpu.memory_space<vmem>>, vector<16x1xf32>
    %40 = vector.broadcast %39 : vector<16x1xf32> to vector<16x256xf32>
    %41 = arith.addf %38, %40 : vector<16x256xf32>
    %42 = arith.negf %41 : vector<16x256xf32>
    %43 = math.exp %42 : vector<16x256xf32>
    %cst_17 = arith.constant 1.000000e+00 : f32
    %44 = vector.broadcast %cst_17 : f32 to vector<16x256xf32>
    %45 = arith.addf %44, %43 : vector<16x256xf32>
    %46 = arith.divf %44, %45 : vector<16x256xf32>
    %47 = arith.mulf %41, %46 : vector<16x256xf32>
    %c0_18 = arith.constant 0 : index
    %c0_19 = arith.constant 0 : index
    %c0_20 = arith.constant 0 : index
    %48 = vector.load %arg6[%c0_18, %c0_19, %c0_20] : memref<1x16x256xf32, #tpu.memory_space<vmem>>, vector<1x16x256xf32>
    %49 = vector.shape_cast %48 : vector<1x16x256xf32> to vector<16x256xf32>
    %50 = vector.shape_cast %47 : vector<16x256xf32> to vector<1x16x256xf32>
    tpu.vector_store %arg6[%c0_18, %c0_19, %c0_20], %50 {strides = array<i32>} : memref<1x16x256xf32, #tpu.memory_space<vmem>>, vector<1x16x256xf32>,
    return
  }
  func.func @transform_0(%arg0: i32, %arg1: i32) -> (i32, i32) {
    %c0_i32 = arith.constant 0 : i32
    %c0_i32_0 = arith.constant 0 : i32
    %c0_i32_1 = arith.constant 0 : i32
    return %c0_i32, %c0_i32_0 : i32, i32
  }
  func.func @transform_1(%arg0: i32, %arg1: i32) -> (i32, i32, i32) {
    %c0_i32 = arith.constant 0 : i32
    %c0_i32_0 = arith.constant 0 : i32
    %c0_i32_1 = arith.constant 0 : i32
    return %arg0, %c0_i32, %c0_i32_0 : i32, i32, i32
  }
  func.func @transform_2(%arg0: i32, %arg1: i32) -> (i32, i32) {
    %c0_i32 = arith.constant 0 : i32
    %c0_i32_0 = arith.constant 0 : i32
    return %arg1, %c0_i32 : i32, i32
  }
  func.func @transform_3(%arg0: i32, %arg1: i32) -> (i32, i32) {
    %c0_i32 = arith.constant 0 : i32
    %c0_i32_0 = arith.constant 0 : i32
    return %arg1, %c0_i32 : i32, i32
  }
  func.func @transform_4(%arg0: i32, %arg1: i32) -> (i32, i32, i32) {
    %c0_i32 = arith.constant 0 : i32
    %c0_i32_0 = arith.constant 0 : i32
    return %arg0, %arg1, %c0_i32 : i32, i32, i32
  }
}

</mosaic_0001>

<bundles_post_ra>
// kernel: conv_sc_forward.1
= control target key start
LH: loop header
LB: loop body
LE: loop exit
PB: predicated region body
PF: predicated region fallthrough
CT: control target
= control target key end

     0   :  { %s1449_s15 = smov 0   ;;  %s1451_s16 = smov 0   ;;  %s1990_s0 = inlined_call_operand.vmem [shape: s32[2,256], index: 0, kind: input, shape index: {}]   ;;  %s1991_s1 = inlined_call_operand.vmem [shape: bf16[2,16,256], index: 1, kind: input, shape index: {}]   ;;  %s1992_s2 = inlined_call_operand.vmem [shape: bf16[32,144], index: 2, kind: input, shape index: {}]   ;;  %s1993_s3 = inlined_call_operand.vmem [shape: f32[32,3], index: 3, kind: input, shape index: {}]   ;;  %s1994_s4 = inlined_call_operand.vmem [shape: f32[2,32,256], index: 4, kind: output, shape index: {}]  }
   0x1   :  { %s1453_s17 = smov 0   ;;  %s1455_s18 = smov 0  }
   0x2   :  { %s1457_s19 = smov 0  }
   0x3 LB: > { %s23_s20 = sadd.s32 1, %s1401_s17  ;;  %s26_s21 = sadd.s32 1, %s1405_s18  ;;  %s1409_s19 = sphi %s1457_s19, %s14_s19   ;;  %s1405_s18 = sphi %s1455_s18, %s2036_s18   ;;  %s1401_s17 = sphi %s1453_s17, %s2035_s17   ;;  %s1397_s16 = sphi %s1451_s16, %s2034_s16   ;;  %s1393_s15 = sphi %s1449_s15, %s2033_s15  }
   0x4   : > { %p24_p0 = scmp.ge.s32.totalorder %s23_s20, 2  ;;  %p1104_p1 = scmp.ge.s32.totalorder %s1409_s19, 1 }
   0x5   : > { %p199_p2 = scmp.lt.s32.totalorder %s1409_s19, 5 }
   0x6   : > { %s2038_s20 = smov (%p24_p0, %s23_s20), 0  ;;  %s2040_s21 = smov (!%p24_p0, %s26_s21), %s1405_s18 }
   0x7   : > { %p200_p3 = pnand %p1104_p1, %p199_p2  ;;  %p28_p4 = scmp.ge.s32.totalorder %s2040_s21, 2 }
   0x8   : > { %p241_p5 = scmp.lt.s32.totalorder (!%p200_p3), %s1397_s16, 1  ;;  %s1107_s22 = sshll.u32 (!%p200_p3), %s1393_s15, 1 }
   0x9   : > { %s2042_s21 = smov (%p28_p4, %s2040_s21), 0  ;;  %203 = sbr.rel (%p200_p3) target bundleno = 745 (0x2e9), region = 36 }
   0xa   : > { %p247_p6 = scmp.lt.s32.totalorder (!%p200_p3), %s1107_s22, 3  ;;  %p1116_p7 = scmp.ne.s32.totalorder (!%p200_p3), %s1393_s15, 0 }
   0xe   : > { %s2044_s16 = smov (!%p241_p5, %s1397_s16), 1  ;;  %s2046_s22 = smov (!%p247_p6, %s1107_s22), 3 }
   0xf   : > { %s1163_s23 = sshll.u32 %s2044_s16, 4  ;;  %s1114_s24 = sshll.u32 %s2044_s16, 3 }
  0x10   : > { %s245_s27 = scalar_lea.vmem %s1991_s1, %s1163_s23  ;;  %s1164_s28 = sshll.u32 %s2046_s22, 3 }
  0x11   : > { %s1488_s5 = scalar_lea.vmem %s1992_s2, %s1164_s28  ;;  %s1493_s8 = scalar_lea.vmem %s1993_s3, %s1164_s28 }
  0x12   : > { %s1113_s9 = sshll.u32 %s2046_s22, 1  ;;  %274 = sbr.rel (%p1116_p7) target bundleno = 181 (0xb5), region = 40 }
  0x13   : > { %s266_s10 = sadd.s32 %s1114_s24, %s1113_s9  ;;  %s1411_s15 = smov (!%p1116_p7), 16  }
  0x14   : > { %s1115_s11 = sshll.u32 %s266_s10, 3  ;;  %s1412_s23 = smov (!%p1116_p7), 17  }
  0x15   : > { %s1498_s14 = scalar_lea.vmem %s1994_s4, %s1115_s11  ;;  %s1414_s26 = smov (!%p1116_p7), 15  }
  0x16   : > { %s1416_s28 = smov (!%p1116_p7), 127   ;;  %s1417_s29 = smov (!%p1116_p7), 113  }
  0x17   : > { %v1501_v0 = vld [vmem:[%s245_s27] sm:$0xff]  ;;  %v1503_v1 = vld [vmem:[%s245_s27 + $0x8] sm:$0xff]  ;;  %v292_v8 = vlaneseq  ;;  %v1413_v18 = vmov 0   ;;  %s1415_s27 = smov 1   ;;  %s1418_s30 = smov 112  }
  0x18   : > { %v277_v2 = vunpack.c.l.bf16 %v1501_v0  ;;  %v278_v3 = vunpack.c.h.bf16 %v1501_v0  ;;  %v279_v4 = vunpack.c.l.bf16 %v1503_v1  ;;  %v280_v5 = vunpack.c.h.bf16 %v1503_v1  ;;  %v281_v6 = vld [vmem:[%s1990_s0] ss:$2 sm:$0x3]  ;;  %v1529_v11 = vld [vmem:[%s1990_s0 + $0x1] ss:$2 sm:$0x3] }
  0x19   : > { %v299_v10 = vadd.s32 4294967295, %v281_v6  ;;  %v310_v12 = vshrl.u32 %v292_v8, 7  ;;  %vm350_vm3 = vcmp.ge.s32.totalorder %v1529_v11, 0  ;;  %vm352_vm4 = vcmp.lt.s32.totalorder %v1529_v11, 16  ;;  %s1419_s6 = smov 111  }
  0x1a   : > { %v1516_v7 = vpack.i.bf16 %v279_v4, %v277_v2  ;;  %v1524_v9 = vpack.i.bf16 %v280_v5, %v278_v3  ;;  %v300_v16 = vadd.s32 4294967295, %v1529_v11  ;;  %v1552_v17 = vadd.s32 1, %v1529_v11 }
  0x1b   : > { %vm301_vm0 = vcmp.ge.s32.totalorder %v299_v10, 0  ;;  %vm302_vm1 = vcmp.lt.s32.totalorder %v299_v10, 16  ;;  %v1540_v14 = vsub.s32 0, %v310_v12  ;;  %v1542_v15 = vsub.s32 1, %v310_v12 }
  0x1c   : > { %1253 = vrot.lane.b32.xlu1 %v1516_v7, %s1411_s15  ;;  %1243 = vrot.lane.b32.xlu0 %v1516_v7, %s1412_s23  ;;  %vm1532_vm2 = vmand %vm301_vm0, %vm302_vm1  ;;  %vm443_vm7 = vcmp.ge.s32.totalorder %v281_v6, 0  ;;  %vm444_vm8 = vcmp.lt.s32.totalorder %v281_v6, 16  ;;  %vm304_vm9 = vcmp.ge.s32.totalorder %v300_v16, 0  ;;  %vm306_vm10 = vcmp.lt.s32.totalorder %v300_v16, 16 }
  0x1d   : > { %vm351_vm5 = vmand %vm1532_vm2, %vm350_vm3  ;;  %vm397_vm13 = vcmp.ge.s32.totalorder %v1552_v17, 0  ;;  %vm399_vm14 = vcmp.lt.s32.totalorder %v1552_v17, 16  ;;  %v565_v26 = vadd.s32 1, %v281_v6  ;;  %v1686_v55 = vand.u32 127, %v292_v8 }
  0x1e   : > { %vm353_vm6 = vmand %vm351_vm5, %vm352_vm4 }
  0x1f   : > { %v1555_v19 = vsel %vm353_vm6, 1, %v1413_v18  ;;  %vm1557_vm11 = vmand %vm443_vm7, %vm444_vm8  ;;  %vm566_vm8 = vcmp.ge.s32.totalorder %v565_v26, 0 }
  0x20   : > { %1258 = vrot.lane.b32.xlu1 %v1524_v9, %s1411_s15  ;;  %1248 = vrot.lane.b32.xlu0 %v1524_v9, %s1412_s23  ;;  %v358_v21 = vrot.slane %v1555_v19, %v1540_v14  ;;  %v362_v22 = vrot.slane %v1555_v19, %v1542_v15  ;;  %vm305_vm12 = vmand %vm1532_vm2, %vm304_vm9 }
  0x21   : > { %vm307_vm15 = vmand %vm305_vm12, %vm306_vm10  ;;  %vm567_vm12 = vcmp.lt.s32.totalorder %v565_v26, 16 }
  0x22   : > { %v1574_v23 = vsel %vm307_vm15, 1, %v1413_v18  ;;  %vm398_vm0 = vmand %vm1532_vm2, %vm397_vm13 }
  0x23   : > { %v312_v24 = vrot.slane %v1574_v23, %v1540_v14  ;;  %v316_v25 = vrot.slane %v1574_v23, %v1542_v15  ;;  %vm400_vm1 = vmand %vm398_vm0, %vm399_vm14 }
  0x24   : > { %1268 = vrot.lane.b32.xlu1 %v1524_v9, %s1414_s26  ;;  %1263 = vrot.lane.b32.xlu0 %v1516_v7, %s1414_s26  ;;  %v1587_v27 = vsel %vm400_vm1, 1, %v1413_v18  ;;  %vm446_vm5 = vmand %vm1557_vm11, %vm304_vm9 }
  0x25   : > { %v405_v28 = vrot.slane %v1587_v27, %v1540_v14  ;;  %v409_v29 = vrot.slane %v1587_v27, %v1542_v15  ;;  %vm447_vm2 = vmand %vm446_vm5, %vm306_vm10 }
  0x26   : > { %v1600_v30 = vsel %vm447_vm2, 1, %v1413_v18  ;;  %vm477_vm6 = vmand %vm1557_vm11, %vm350_vm3 }
  0x27   : > { %v452_v31 = vrot.slane %v1600_v30, %v1540_v14  ;;  %v456_v32 = vrot.slane %v1600_v30, %v1542_v15  ;;  %vm478_vm7 = vmand %vm477_vm6, %vm352_vm4 }
  0x28   : > { %1278 = vrot.lane.b32.xlu1 %v1524_v9, %s1415_s27  ;;  %1273 = vrot.lane.b32.xlu0 %v1516_v7, %s1415_s27  ;;  %v479_v33 = vsel %vm478_vm7, 1, %v1413_v18  ;;  %vm521_vm15 = vmand %vm1557_vm11, %vm397_vm13 }
  0x29   : > { %v483_v34 = vrot.slane %v479_v33, %v1540_v14  ;;  %v487_v35 = vrot.slane %v479_v33, %v1542_v15  ;;  %vm522_vm0 = vmand %vm521_vm15, %vm399_vm14  ;;  %vm1714_vm15 = vcmp.eq.s32.totalorder %v316_v25, 1 }
  0x2a   : > { %v1624_v36 = vsel %vm522_vm0, 1, %v1413_v18  ;;  %vm1626_vm1 = vmand %vm566_vm8, %vm567_vm12  ;;  %vm1700_vm8 = vcmp.eq.s32.totalorder %v362_v22, 1  ;;  %vm1707_vm12 = vcmp.eq.s32.totalorder %v312_v24, 1  ;;  %vm391_vm0 = vcmp.lt.s32.totalorder %v1686_v55, 15 }
  0x2b   : > { %vm488_vm11 = vcmp.eq.s32.totalorder %v483_v34, 1  ;;  %vm489_vm5 = vcmp.eq.s32.totalorder %v487_v35, 1  ;;  %v527_v38 = vrot.slane %v1624_v36, %v1540_v14  ;;  %v531_v39 = vrot.slane %v1624_v36, %v1542_v15  ;;  %vm569_vm2 = vmand %vm1626_vm1, %vm304_vm9 }
  0x2c   : > { %1288 = vrot.lane.b32.xlu1 %v1524_v9, %s1416_s28  ;;  %1283 = vrot.lane.b32.xlu0 %v1516_v7, %s1416_s28  ;;  %v491_v40 = vsel %vm489_vm5, %v278_v3, 0.0  ;;  %v492_v41 = vsel %vm488_vm11, %v279_v4, 0.0  ;;  %v493_v42 = vsel %vm489_vm5, %v280_v5, 0.0  ;;  %v490_v43 = vsel %vm488_vm11, %v277_v2, 0.0  ;;  %vm570_vm6 = vmand %vm569_vm2, %vm306_vm10 }
  0x2d   : > { %v1174_v44 = vpack.c.bf16 %v493_v42, %v492_v41  ;;  %v1173_v45 = vpack.c.bf16 %v491_v40, %v490_v43  ;;  %vm613_vm9 = vmand %vm1626_vm1, %vm350_vm3  ;;  %v1653_v46 = vsel %vm570_vm6, 1, %v1413_v18  ;;  %vm345_vm10 = vcmp.lt.s32.totalorder %v1686_v55, 16 }
  0x2e   : > { %vm614_vm7 = vmand %vm613_vm9, %vm352_vm4  ;;  %v575_v47 = vrot.slane %v1653_v46, %v1540_v14  ;;  %v579_v48 = vrot.slane %v1653_v46, %v1542_v15  ;;  %vm1729_vm11 = vcmp.eq.s32.totalorder %v409_v29, 1  ;;  %vm438_vm5 = vcmp.lt.s32.totalorder %v1686_v55, 1 }
  0x2f   : > { %507 = vst [vmem:[#allocation2 + $0x40] sm:$0xff] %v1174_v44  ;;  %506 = vst [vmem:[#allocation2 + $0x88] sm:$0xff] %v1173_v45  ;;  %v1662_v49 = vsel %vm614_vm7, 1, %v1413_v18  ;;  %vm1737_vm2 = vcmp.eq.s32.totalorder %v452_v31, 1  ;;  %vm1744_vm6 = vcmp.eq.s32.totalorder %v456_v32, 1  ;;  %vm516_vm9 = vcmp.lt.s32.totalorder %v1686_v55, 127 }
  0x30   : > { %1298 = vrot.lane.b32.xlu1 %v1524_v9, %s1417_s29  ;;  %1293 = vrot.lane.b32.xlu0 %v1516_v7, %s1417_s29  ;;  %vm657_vm3 = vmand %vm1626_vm1, %vm397_vm13  ;;  %v619_v50 = vrot.slane %v1662_v49, %v1540_v14  ;;  %v623_v51 = vrot.slane %v1662_v49, %v1542_v15  ;;  %vm294_vm13 = vcmp.lt.s32.totalorder %v1686_v55, 17  ;;  %vm1722_vm1 = vcmp.eq.s32.totalorder %v405_v28, 1 }
  0x31   : > { %vm658_vm4 = vmand %vm657_vm3, %vm399_vm14  ;;  %vm1693_vm14 = vcmp.eq.s32.totalorder %v358_v21, 1  ;;  %vm1784_vm7 = vcmp.eq.s32.totalorder %v527_v38, 1  ;;  %vm1791_vm3 = vcmp.eq.s32.totalorder %v531_v39, 1 }
  0x32   : > { %v1677_v52 = vsel %vm658_vm4, 1, %v1413_v18  ;;  %vm560_vm4 = vcmp.lt.s32.totalorder %v1686_v55, 113 }
  0x33   : > { %v663_v53 = vrot.slane %v1677_v52, %v1540_v14  ;;  %v667_v54 = vrot.slane %v1677_v52, %v1542_v15 }
  0x34   : > { %1308 = vrot.lane.b32.xlu1 %v1524_v9, %s1418_s30  ;;  %1303 = vrot.lane.b32.xlu0 %v1516_v7, %s1418_s30 }
  0x38   : > { %1318 = vrot.lane.b32.xlu1 %v1524_v9, %s1419_s6  ;;  %1313 = vrot.lane.b32.xlu0 %v1516_v7, %s1419_s6 }
  0x8e   : > { %v1254_v56 = vpop.permute.xlu1 %1253  ;;  %v1244_v57 = vpop.permute.xlu0 %1243 }
  0x8f   : > { %v1256_v62 = vunpack.i.h.bf16 %v1254_v56  ;;  %v1255_v63 = vunpack.i.l.bf16 %v1254_v56  ;;  %v1246_v8 = vunpack.i.h.bf16 %v1244_v57  ;;  %v1245_v9 = vunpack.i.l.bf16 %v1244_v57 }
  0x92   : > { %v1259_v0 = vpop.permute.xlu1 %1258  ;;  %v1249_v1 = vpop.permute.xlu0 %1248 }
  0x93   : > { %v1261_v4 = vunpack.i.h.bf16 %v1259_v0  ;;  %v1260_v5 = vunpack.i.l.bf16 %v1259_v0  ;;  %v1251_v6 = vunpack.i.h.bf16 %v1249_v1  ;;  %v1250_v7 = vunpack.i.l.bf16 %v1249_v1 }
  0x95   : > { %v346_v12 = vsel %vm345_vm10, %v1255_v63, %v1260_v5  ;;  %v347_v13 = vsel %vm345_vm10, %v1256_v62, %v1261_v4  ;;  %v348_v16 = vsel %vm345_vm10, %v1260_v5, %v1255_v63  ;;  %v349_v17 = vsel %vm345_vm10, %v1261_v4, %v1256_v62 }
  0x96   : > { %v365_v18 = vsel %vm1693_vm14, %v348_v16, 0.0  ;;  %v366_v19 = vsel %vm1700_vm8, %v346_v12, 0.0  ;;  %v367_v20 = vsel %vm1693_vm14, %v349_v17, 0.0  ;;  %v368_v21 = vsel %vm1700_vm8, %v347_v13, 0.0  ;;  %v1269_v22 = vpop.permute.xlu1 %1268  ;;  %v1264_v23 = vpop.permute.xlu0 %1263 }
  0x97   : > { %v1167_v24 = vpack.c.bf16 %v366_v19, %v365_v18  ;;  %v1168_v25 = vpack.c.bf16 %v368_v21, %v367_v20  ;;  %v295_v26 = vsel %vm294_vm13, %v1245_v9, %v1250_v7  ;;  %v296_v27 = vsel %vm294_vm13, %v1246_v8, %v1251_v6 }
  0x98   : > { %v297_v28 = vsel %vm294_vm13, %v1250_v7, %v1245_v9  ;;  %v298_v29 = vsel %vm294_vm13, %v1251_v6, %v1246_v8  ;;  %v320_v30 = vsel %vm1714_vm15, %v295_v26, 0.0  ;;  %v322_v31 = vsel %vm1714_vm15, %v296_v27, 0.0 }
  0x99   : > { %381 = vst [vmem:[#allocation2 + $0x78] sm:$0xff] %v1167_v24  ;;  %382 = vst [vmem:[#allocation2 + $0x58] sm:$0xff] %v1168_v25  ;;  %v319_v32 = vsel %vm1707_vm12, %v297_v28, 0.0  ;;  %v321_v33 = vsel %vm1707_vm12, %v298_v29, 0.0  ;;  %v1271_v34 = vunpack.i.h.bf16 %v1269_v22  ;;  %v1270_v35 = vunpack.i.l.bf16 %v1269_v22 }
  0x9a   : > { %v1165_v41 = vpack.c.bf16 %v320_v30, %v319_v32  ;;  %v1166_v42 = vpack.c.bf16 %v322_v31, %v321_v33  ;;  %v1266_v43 = vunpack.i.h.bf16 %v1264_v23  ;;  %v1265_v44 = vunpack.i.l.bf16 %v1264_v23  ;;  %v1279_v45 = vpop.permute.xlu1 %1278  ;;  %v1274_v56 = vpop.permute.xlu0 %1273 }
  0x9b   : > { %v1281_v57 = vunpack.i.h.bf16 %v1279_v45  ;;  %v1280_v58 = vunpack.i.l.bf16 %v1279_v45  ;;  %v1276_v59 = vunpack.i.h.bf16 %v1274_v56  ;;  %v1275_v38 = vunpack.i.l.bf16 %v1274_v56 }
  0x9c   : > { %335 = vst [vmem:[#allocation2] sm:$0xff] %v1165_v41  ;;  %336 = vst [vmem:[#allocation2 + $0x38] sm:$0xff] %v1166_v42  ;;  %v393_v60 = vsel %vm391_vm0, %v1266_v43, %v1271_v34  ;;  %v395_v36 = vsel %vm391_vm0, %v1271_v34, %v1266_v43  ;;  %v392_v39 = vsel %vm391_vm0, %v1265_v44, %v1270_v35  ;;  %vm608_vm10 = vcmp.lt.s32.totalorder %v1686_v55, 112 }
  0x9d   : > { %v394_v61 = vsel %vm391_vm0, %v1270_v35, %v1265_v44  ;;  %v414_v62 = vsel %vm1722_vm1, %v395_v36, 0.0  ;;  %v415_v63 = vsel %vm1729_vm11, %v393_v60, 0.0  ;;  %v413_v1 = vsel %vm1729_vm11, %v392_v39, 0.0 }
  0x9e   : > { %v412_v0 = vsel %vm1722_vm1, %v394_v61, 0.0  ;;  %v1170_v4 = vpack.c.bf16 %v415_v63, %v414_v62  ;;  %v440_v6 = vsel %vm438_vm5, %v1276_v59, %v1281_v57  ;;  %v442_v7 = vsel %vm438_vm5, %v1281_v57, %v1276_v59  ;;  %v1289_v8 = vpop.permute.xlu1 %1288  ;;  %v1284_v9 = vpop.permute.xlu0 %1283 }
  0x9f   : > { %v1169_v5 = vpack.c.bf16 %v413_v1, %v412_v0  ;;  %v461_v12 = vsel %vm1737_vm2, %v442_v7, 0.0  ;;  %v462_v2 = vsel %vm1744_vm6, %v440_v6, 0.0  ;;  %v439_v3 = vsel %vm438_vm5, %v1275_v38, %v1280_v58 }
  0xa0   : > { %v441_v13 = vsel %vm438_vm5, %v1280_v58, %v1275_v38  ;;  %429 = vst [vmem:[#allocation2 + $0x8] sm:$0xff] %v1170_v4  ;;  %v1172_v16 = vpack.c.bf16 %v462_v2, %v461_v12  ;;  %v460_v18 = vsel %vm1744_vm6, %v439_v3, 0.0  ;;  %v1291_v19 = vunpack.i.h.bf16 %v1289_v8 }
  0xa1   : > { %428 = vst [vmem:[#allocation2 + $0x20] sm:$0xff] %v1169_v5  ;;  %v459_v17 = vsel %vm1737_vm2, %v441_v13, 0.0  ;;  %v1290_v21 = vunpack.i.l.bf16 %v1289_v8  ;;  %v1286_v22 = vunpack.i.h.bf16 %v1284_v9  ;;  %v1285_v23 = vunpack.i.l.bf16 %v1284_v9 }
  0xa2   : > { %v1171_v20 = vpack.c.bf16 %v460_v18, %v459_v17  ;;  %476 = vst [vmem:[#allocation2 + $0x80] sm:$0xff] %v1172_v16  ;;  %v1299_v24 = vpop.permute.xlu1 %1298  ;;  %vm1832_vm13 = vcmp.eq.s32.totalorder %v575_v47, 1  ;;  %vm1839_vm14 = vcmp.eq.s32.totalorder %v579_v48, 1  ;;  %v1294_v11 = vpop.permute.xlu0 %1293  ;;  %vm1846_vm8 = vcmp.eq.s32.totalorder %v619_v50, 1 }
  0xa3   : > { %vm1853_vm12 = vcmp.eq.s32.totalorder %v623_v51, 1  ;;  %v518_v46 = vsel %vm516_vm9, %v1286_v22, %v1291_v19  ;;  %v520_v48 = vsel %vm516_vm9, %v1291_v19, %v1286_v22  ;;  %v517_v50 = vsel %vm516_vm9, %v1285_v23, %v1290_v21 }
  0xa4   : > { %475 = vst [vmem:[#allocation2 + $0x70] sm:$0xff] %v1171_v20  ;;  %v519_v27 = vsel %vm516_vm9, %v1290_v21, %v1285_v23  ;;  %v536_v49 = vsel %vm1784_vm7, %v518_v46, 0.0  ;;  %v537_v51 = vsel %vm1791_vm3, %v520_v48, 0.0  ;;  %v534_v28 = vsel %vm1784_vm7, %v517_v50, 0.0 }
  0xa5   : > { %v535_v29 = vsel %vm1791_vm3, %v519_v27, 0.0  ;;  %vm652_vm15 = vcmp.lt.s32.totalorder %v1686_v55, 111  ;;  %v1176_v30 = vpack.c.bf16 %v537_v51, %v536_v49  ;;  %v1301_v32 = vunpack.i.h.bf16 %v1299_v24 }
  0xa6   : > { %v1175_v31 = vpack.c.bf16 %v535_v29, %v534_v28  ;;  %v1300_v33 = vunpack.i.l.bf16 %v1299_v24  ;;  %v1296_v34 = vunpack.i.h.bf16 %v1294_v11  ;;  %v1295_v35 = vunpack.i.l.bf16 %v1294_v11  ;;  %v1309_v41 = vpop.permute.xlu1 %1308  ;;  %v1304_v42 = vpop.permute.xlu0 %1303 }
  0xa7   : > { %vm1877_vm0 = vcmp.eq.s32.totalorder %v663_v53, 1  ;;  %vm1884_vm1 = vcmp.eq.s32.totalorder %v667_v54, 1  ;;  %551 = vst [vmem:[#allocation2 + $0x28] sm:$0xff] %v1176_v30  ;;  %v1311_v40 = vunpack.i.h.bf16 %v1309_v41  ;;  %v1310_v44 = vunpack.i.l.bf16 %v1309_v41 }
  0xa8   : > { %550 = vst [vmem:[#allocation2 + $0x50] sm:$0xff] %v1175_v31  ;;  %v1306_v45 = vunpack.i.h.bf16 %v1304_v42  ;;  %v1305_v56 = vunpack.i.l.bf16 %v1304_v42  ;;  %v562_v14 = vsel %vm560_vm4, %v1296_v34, %v1301_v32  ;;  %v564_v53 = vsel %vm560_vm4, %v1301_v32, %v1296_v34 }
  0xa9   : > { %v561_v57 = vsel %vm560_vm4, %v1295_v35, %v1300_v33  ;;  %v563_v15 = vsel %vm560_vm4, %v1300_v33, %v1295_v35  ;;  %v584_v52 = vsel %vm1832_vm13, %v562_v14, 0.0  ;;  %v585_v54 = vsel %vm1839_vm14, %v564_v53, 0.0 }
  0xaa   : > { %v582_v58 = vsel %vm1832_vm13, %v561_v57, 0.0  ;;  %v583_v59 = vsel %vm1839_vm14, %v563_v15, 0.0  ;;  %v1178_v38 = vpack.c.bf16 %v585_v54, %v584_v52  ;;  %v610_v36 = vsel %vm608_vm10, %v1306_v45, %v1311_v40  ;;  %v1319_v61 = vpop.permute.xlu1 %1318  ;;  %v1314_v62 = vpop.permute.xlu0 %1313 }
  0xab   : > { %v1177_v60 = vpack.c.bf16 %v583_v59, %v582_v58  ;;  %v612_v39 = vsel %vm608_vm10, %v1311_v40, %v1306_v45  ;;  %v628_v63 = vsel %vm1846_vm8, %v610_v36, 0.0  ;;  %v609_v1 = vsel %vm608_vm10, %v1305_v56, %v1310_v44 }
  0xac   : > { %v629_v0 = vsel %vm1853_vm12, %v612_v39, 0.0  ;;  %v611_v4 = vsel %vm608_vm10, %v1310_v44, %v1305_v56  ;;  %599 = vst [vmem:[#allocation2 + $0x48] sm:$0xff] %v1178_v38  ;;  %v626_v6 = vsel %vm1846_vm8, %v609_v1, 0.0  ;;  %v1321_v8 = vunpack.i.h.bf16 %v1319_v61 }
  0xad   : > { %598 = vst [vmem:[#allocation2 + $0x10] sm:$0xff] %v1177_v60  ;;  %v1180_v5 = vpack.c.bf16 %v629_v0, %v628_v63  ;;  %v627_v7 = vsel %vm1853_vm12, %v611_v4, 0.0  ;;  %v1320_v12 = vunpack.i.l.bf16 %v1319_v61  ;;  %v1316_v2 = vunpack.i.h.bf16 %v1314_v62 }
  0xae   : > { %v1179_v9 = vpack.c.bf16 %v627_v7, %v626_v6  ;;  %v1315_v3 = vunpack.i.l.bf16 %v1314_v62 }
  0xaf   : > { %643 = vst [vmem:[#allocation2 + $0x18] sm:$0xff] %v1180_v5  ;;  %v654_v13 = vsel %vm652_vm15, %v1316_v2, %v1321_v8  ;;  %v656_v16 = vsel %vm652_vm15, %v1321_v8, %v1316_v2 }
  0xb0   : > { %642 = vst [vmem:[#allocation2 + $0x30] sm:$0xff] %v1179_v9  ;;  %v653_v17 = vsel %vm652_vm15, %v1315_v3, %v1320_v12  ;;  %v655_v18 = vsel %vm652_vm15, %v1320_v12, %v1315_v3  ;;  %v672_v19 = vsel %vm1877_vm0, %v654_v13, 0.0  ;;  %v673_v20 = vsel %vm1884_vm1, %v656_v16, 0.0 }
  0xb1   : > { %v670_v21 = vsel %vm1877_vm0, %v653_v17, 0.0  ;;  %v671_v22 = vsel %vm1884_vm1, %v655_v18, 0.0  ;;  %v1182_v23 = vpack.c.bf16 %v673_v20, %v672_v19 }
  0xb2   : > { %v1181_v24 = vpack.c.bf16 %v671_v22, %v670_v21 }
  0xb3   : > { %687 = vst [vmem:[#allocation2 + $0x60] sm:$0xff] %v1182_v23 }
  0xb4   : > { %686 = vst [vmem:[#allocation2 + $0x68] sm:$0xff] %v1181_v24 }
  0xb5 PF: > { %v1420_v10 = vmov 0   ;;  %v1329_v11 = vld [vmem:[#allocation2 + $0x14] ss:$56 sps:$4 sm:$0xff]   ;;  %v1331_v26 = vld [vmem:[#allocation2 + $0x10] ss:$56 sps:$4 sm:$0xff]   ;;  %vm819_vm11 = vcmask 130048   ;;  %v869_v44 = vlaneseq }
  0xb6   : > { %1322 = vset.pattern.permute.xlu0 %v1420_v10  ;;  %v1332_v47 = vld [vmem:[#allocation2 + $0x54] ss:$-40 sps:$4 sm:$0xff]   ;;  %v1334_v46 = vld [vmem:[#allocation2 + $0x50] ss:$-40 sps:$4 sm:$0xff]   ;;  %v1938_v51 = vld [vmem:[%s1493_s8] sm:$0xff]  ;;  %v1421_v18 = vmov 1  }
  0xb7   : > { %v1326_v25 = vld [vmem:[#allocation2 + $0x34] ss:$-24 sps:$4 sm:$0xff]   ;;  %v1328_v55 = vld [vmem:[#allocation2 + $0x30] ss:$-24 sps:$4 sm:$0xff]   ;;  %v1335_v48 = vld [vmem:[#allocation2 + $0x8c] ss:$-72 sps:$4 sm:$0xff]   ;;  %712 = vperm.xlu0 %1322, %v1938_v51   ;;  %1324 = vset.pattern.permute.xlu1 %v1421_v18 }
  0xb8   : > { %823 = vmatprep.subr.bf16.mxu0 %v1326_v25  ;;  %v1337_v50 = vld [vmem:[#allocation2 + $0x88] ss:$-72 sps:$4 sm:$0xff]   ;;  %v1338_v27 = vld [vmem:[#allocation2 + $0x74] ss:$16 sps:$4 sm:$0xff]   ;;  %v692_v31 = vld [vmem:[#allocation2 + $0x78] sm:$0xff]  ;;  %v870_v56 = vshrl.u32 %v869_v44, 7 }
  0xb9   : > { %824 = vmatpush1.bf16.msra.mxu0 %v1328_v55  ;;  %v1352_v49 = vld [vmem:[%s1488_s5 + $0x4] ss:$8 sps:$4 sm:$0xff]   ;;  %v1340_v29 = vld [vmem:[#allocation2 + $0x70] ss:$16 sps:$4 sm:$0xff]   ;;  %v693_v32 = vld [vmem:[#allocation2 + $0x58] sm:$0xff]  ;;  %v1422_v19 = vmov 2  }
  0xba   : > { %825 = vmatprep.subr.bf16.mxu0 %v1329_v11  ;;  %1156 = vmatprep.mubr.msk.bf16.mxu0 %vm819_vm11, %v1352_v49  ;;  %v1942_v28 = vld [vmem:[%s1493_s8 + $0x8] sm:$0xff]  ;;  %v1141_v34 = vcombine.high %v692_v31, %v693_v32  ;;  %v1140_v35 = vcombine.low %v692_v31, %v693_v32  ;;  %v1344_v41 = vld [vmem:[#allocation2 + $0x4] ss:$56 sps:$4 sm:$0xff]   ;;  %v1346_v42 = vld [vmem:[#allocation2] ss:$56 sps:$4 sm:$0xff]   ;;  %v871_v14 = vsub.s32 0, %v870_v56 }
  0xbb   : > { %v1341_v30 = vld [vmem:[#allocation2 + $0x24] ss:$-24 sps:$4 sm:$0xff]   ;;  %717 = vperm.xlu0 %1322, %v1942_v28   ;;  %v1343_v33 = vld [vmem:[#allocation2 + $0x20] ss:$-24 sps:$4 sm:$0xff]   ;;  %v875_v57 = vsub.s32 1, %v870_v56  ;;  %s1423_s16 = smov 0.0  }
  0xbc   : > { %v1347_v43 = vld [vmem:[#allocation2 + $0x6c] ss:$-8 sps:$4 sm:$0xff]   ;;  %v1349_v37 = vld [vmem:[#allocation2 + $0x68] ss:$-8 sps:$4 sm:$0xff]  }
  0xbd   : > { %826 = vmatpush1.bf16.msra.mxu0 %v1331_v26  ;;  %v1350_v40 = vld [vmem:[%s1488_s5] ss:$8 sps:$4 sm:$0xff]  }
  0xbe   : > { %827 = vmatprep.subr.bf16.mxu0 %v1332_v47  ;;  %v866_v45 = vld [vmem:[%s1990_s0] ss:$2 sm:$0x3] }
  0xbf   : > { %vm867_vm5 = vcmp.lt.s32.totalorder %v866_v45, 16  ;;  %1323 = vset.pattern.permute.xlu0 %v1421_v18 }
  0xc0   : > { %v868_v53 = vsel %vm867_vm5, 1, %v1420_v10  ;;  %931 = vperm.xlu0 %1323, %v1938_v51  }
  0xc1   : > { %828 = vmatpush1.bf16.msra.mxu0 %v1334_v46  ;;  %v872_v15 = vrot.slane %v868_v53, %v871_v14  ;;  %v876_v54 = vrot.slane %v868_v53, %v875_v57 }
  0xc2   : > { %829 = vmatprep.subr.bf16.mxu0 %v1335_v48 }
  0xc3   : > { %vm877_vm2 = vcmp.eq.s32.totalorder %v872_v15, 1  ;;  %vm878_vm6 = vcmp.eq.s32.totalorder %v876_v54, 1 }
  0xc4   : > { %1325 = vset.pattern.permute.xlu0 %v1422_v19 }
  0xc5   : > { %830 = vmatpush1.bf16.msra.mxu0 %v1337_v50  ;;  %943 = vperm.xlu0 %1325, %v1938_v51  }
  0xc6   : > { %831 = vmatprep.subr.bf16.mxu0 %v1338_v27 }
  0xc9   : > { %832 = vmatpush1.bf16.msra.mxu0 %v1340_v29  ;;  %947 = vperm.xlu0 %1325, %v1942_v28  }
  0xca   : > { %833 = vmatprep.subr.bf16.mxu0 %v1341_v30 }
  0xcd   : > { %834 = vmatpush1.bf16.msra.mxu0 %v1343_v33 }
  0xce   : > { %835 = vmatprep.subr.bf16.mxu0 %v1141_v34 }
  0xd1   : > { %836 = vmatpush1.bf16.msra.mxu0 %v1140_v35 }
  0xd2   : > { %837 = vmatprep.subr.bf16.mxu0 %v1344_v41 }
  0xd5   : > { %838 = vmatpush1.bf16.msra.mxu0 %v1346_v42 }
  0xd6   : > { %853 = vmatprep.subr.bf16.mxu0 %v1347_v43 }
  0xd9   : > { %854 = vmatpush2.bf16.msra.mxu0 %v1349_v37 }
  0xdc   : > { %856 = vmatmul.mubr.bf16.vlgmr.msra.gmra.mxu0 %v1350_v40 }
 0x132   : > { %v713_v52 = vpop.permute.xlu0 %712 }
 0x136   : > { %v718_v39 = vpop.permute.xlu0 %717 }
 0x13b   : > { %v932_v51 = vpop.permute.xlu0 %931 }
 0x140   : > { %v944_v29 = vpop.permute.xlu0 %943 }
 0x144   : > { %v948_v14 = vpop.permute.xlu0 %947 }
 0x19c   : > { %v857_v58 = vpop.f32.mrf.mxu0 }
 0x19d   : > { %v1949_v59 = vadd.f32 %v857_v58, %v713_v52 }
 0x19e   : > { %v859_v38 = vpop.f32.mrf.mxu0 }
 0x19f   : > { %v879_v60 = vsel %vm877_vm2, %v1949_v59, 0.0  ;;  %v1952_v36 = vadd.f32 %v859_v38, %v713_v52 }
 0x1a0   : > { %v861_v61 = vpop.f32.mrf.mxu0  ;;  %v895_v0 = vmul.f32 %v879_v60, %v879_v60 }
 0x1a1   : > { %v1954_v62 = vadd.f32 %v861_v61, %v718_v39  ;;  %v880_v63 = vsel %vm878_vm6, %v1952_v36, 0.0 }
 0x1a2   : > { %v863_v1 = vpop.f32.mrf.mxu0  ;;  %v883_v4 = vadd.f32 %v880_v63, %v879_v60  ;;  %v896_v5 = vmul.f32 %v880_v63, %v880_v63 }
 0x1a3   : > { %v881_v6 = vsel %vm877_vm2, %v1954_v62, 0.0  ;;  %v1959_v7 = vadd.f32 %v863_v1, %v718_v39 }
 0x1a4   : > { %v897_v8 = vmul.f32 %v881_v6, %v881_v6  ;;  %v884_v9 = vadd.f32 %v883_v4, %v881_v6  ;;  %v899_v12 = vadd.f32 %v896_v5, %v895_v0 }
 0x1a5   : > { %v882_v2 = vsel %vm878_vm6, %v1959_v7, 0.0 }
 0x1a6   : > { %v885_v3 = vadd.f32 %v884_v9, %v882_v2  ;;  %v898_v13 = vmul.f32 %v882_v2, %v882_v2  ;;  %v900_v16 = vadd.f32 %v899_v12, %v897_v8 }
 0x1a8   : > { %886 = vadd.xlane.f32.xlu1 %v885_v3  ;;  %v901_v17 = vadd.f32 %v900_v16, %v898_v13 }
 0x1ac   : > { %902 = vadd.xlane.f32.xlu1 %v901_v17 }
 0x1bd   : > { %935 = vperm.xlu1 %1324, %v1942_v28  }
 0x231   : > { %v887_v20 = vpop.xlane.xlu1 %886 }
 0x232   : > { %v888_v21 = vrot.slane %v887_v20, 4 }
 0x234   : > { %v889_v22 = vadd.f32 %v888_v21, %v887_v20 }
 0x235   : > { %v903_v23 = vpop.xlane.xlu1 %902 }
 0x236   : > { %v890_v24 = vrot.slane %v889_v22, 2  ;;  %v904_v25 = vrot.slane %v903_v23, 4 }
 0x238   : > { %v905_v55 = vadd.f32 %v904_v25, %v903_v23  ;;  %v891_v10 = vadd.f32 %v890_v24, %v889_v22 }
 0x239   : > { %v936_v35 = vpop.permute.xlu1 %935 }
 0x23a   : > { %v906_v11 = vrot.slane %v905_v55, 2  ;;  %v892_v26 = vrot.slane %v891_v10, 1 }
 0x23c   : > { %v893_v47 = vadd.f32 %v892_v26, %v891_v10  ;;  %v907_v46 = vadd.f32 %v906_v11, %v905_v55 }
 0x23e   : > { %1183 = vpush %v893_v47  ;;  %v908_v48 = vrot.slane %v907_v46, 1 }
 0x240   : > { %v909_v50 = vadd.f32 %v908_v48, %v907_v46 }
 0x242   : > { %1185 = vpush %v909_v50 }
 0x26f   : > { %s1184_s5 = spop %1183 }
 0x270   : > { %s911_s9 = smul.f32 0.00024414063, %s1184_s5 }
 0x272   : > { %s913_s10 = smul.f32 %s911_s9, %s911_s9  ;;  %v916_v28 = vstv %s911_s9 }
 0x273   : > { %s1186_s11 = spop %1185  ;;  %v917_v30 = vsub.f32 %v1949_v59, %v916_v28  ;;  %v918_v31 = vsub.f32 %v1952_v36, %v916_v28  ;;  %v919_v32 = vsub.f32 %v1954_v62, %v916_v28  ;;  %v920_v33 = vsub.f32 %v1959_v7, %v916_v28 }
 0x274   : > { %s912_s12 = smul.f32 0.00024414063, %s1186_s11 }
 0x276   : > { %s914_s13 = ssub.f32 %s912_s12, %s913_s10 }
 0x278   : > { %s915_s22 = smax.f32 %s1423_s16, %s914_s13 }
 0x279   : > { %s921_s15 = sadd.f32 1e-05, %s915_s22 }
 0x27b   : > { %v922_v27 = vstv %s921_s15 }
 0x27c   : > { %1353 = vrsqrt.f32 %v922_v27 }
 0x289   : > { %v1354_v49 = vpop.eup %1353 }
 0x28a   : > { %1187 = vpush %v1354_v49 }
 0x2bb   : > { %s1188_s23 = spop %1187 }
 0x2bc   : > { %v925_v34 = vstv %s1188_s23 }
 0x2bd   : > { %v926_v41 = vmul.f32 %v925_v34, %v917_v30  ;;  %v927_v42 = vmul.f32 %v925_v34, %v918_v31  ;;  %v928_v43 = vmul.f32 %v925_v34, %v919_v32  ;;  %v929_v37 = vmul.f32 %v925_v34, %v920_v33 }
 0x2bf   : > { %v938_v40 = vmul.f32 %v932_v51, %v926_v41  ;;  %v939_v44 = vmul.f32 %v932_v51, %v927_v42  ;;  %v940_v45 = vmul.f32 %v936_v35, %v928_v43  ;;  %v941_v56 = vmul.f32 %v936_v35, %v929_v37 }
 0x2c1   : > { %v950_v53 = vadd.f32 %v944_v29, %v938_v40  ;;  %v951_v57 = vadd.f32 %v944_v29, %v939_v44  ;;  %v952_v15 = vadd.f32 %v948_v14, %v940_v45  ;;  %v953_v52 = vadd.f32 %v948_v14, %v941_v56 }
 0x2c3   : > { %v1157_v54 = vmul.f32 -1.442695, %v950_v53  ;;  %v1158_v58 = vmul.f32 -1.442695, %v951_v57  ;;  %v1159_v59 = vmul.f32 -1.442695, %v952_v15 }
 0x2c4   : > { %v1160_v38 = vmul.f32 -1.442695, %v953_v52 }
 0x2c5   : > { %1355 = vpow2.f32 %v1157_v54 }
 0x2c6   : > { %1357 = vpow2.f32 %v1158_v58 }
 0x2c7   : > { %1359 = vpow2.f32 %v1159_v59 }
 0x2c8   : > { %1361 = vpow2.f32 %v1160_v38 }
 0x2d2   : > { %v1356_v60 = vpop.eup %1355 }
 0x2d3   : > { %v1358_v36 = vpop.eup %1357  ;;  %v966_v39 = vadd.f32 1.0, %v1356_v60 }
 0x2d4   : > { %v1360_v61 = vpop.eup %1359  ;;  %v967_v62 = vadd.f32 1.0, %v1358_v36 }
 0x2d5   : > { %v1362_v63 = vpop.eup %1361  ;;  %1363 = vrcp.f32 %v966_v39  ;;  %v968_v0 = vadd.f32 1.0, %v1360_v61 }
 0x2d6   : > { %1365 = vrcp.f32 %v967_v62  ;;  %v969_v1 = vadd.f32 1.0, %v1362_v63 }
 0x2d7   : > { %1367 = vrcp.f32 %v968_v0 }
 0x2d8   : > { %1369 = vrcp.f32 %v969_v1 }
 0x2e2   : > { %v1364_v4 = vpop.eup %1363 }
 0x2e3   : > { %v1366_v5 = vpop.eup %1365  ;;  %v978_v6 = vmul.f32 %v1364_v4, %v950_v53 }
 0x2e4   : > { %v1368_v7 = vpop.eup %1367  ;;  %v979_v8 = vmul.f32 %v1366_v5, %v951_v57 }
 0x2e5   : > { %v1370_v9 = vpop.eup %1369  ;;  %982 = vst [vmem:[%s1498_s14] sm:$0xff] %v978_v6  ;;  %v980_v12 = vmul.f32 %v1368_v7, %v952_v15 }
 0x2e6   : > { %983 = vst [vmem:[%s1498_s14 + $0x8] sm:$0xff] %v979_v8  ;;  %v981_v2 = vmul.f32 %v1370_v9, %v953_v52 }
 0x2e7   : > { %984 = vst [vmem:[%s1498_s14 + $0x10] sm:$0xff] %v980_v12 }
 0x2e8   : > { %985 = vst [vmem:[%s1498_s14 + $0x18] sm:$0xff] %v981_v2 }
 0x2e9 PF: > { %s14_s19 = sadd.s32 1, %s1409_s19   ;;  %s2033_s15 = smov %s1401_s17 }
 0x2ea   : > { %p11_p8 = scmp.ge.s32.totalorder %s14_s19, 6   ;;  %s2034_s16 = smov %s1405_s18 }
 0x2eb   : > { %s2035_s17 = smov %s2038_s20  ;;  %s2036_s18 = smov %s2042_s21 }
 0x2ec   :  { %13 = sbr.rel (!%p11_p8) target bundleno = 3 (0x3), region = 77 }

</bundles_post_ra>
